<compile_context>
chip_gen: v5e
topology: v5e:2x2
jax: 0.10.0
libtpu: 0.0.40
codegen_flags: <defaults>
</compile_context>

<pallas_src>
import jax
import jax.numpy as jnp
from jax.experimental import pallas as pl
from jax.experimental.pallas import tpu as pltpu

_LANE = 128
_DEF_BATCH_TILE = 1024          # rows per grid step (amortizes per-step overhead)
_VMEM_BUDGET = 24 * 1024 * 1024  # keep per-step footprint under this (of 32 MiB limit)
_VMEM_LIMIT = 32 * 1024 * 1024   # safe on all of v5e / v6e / v7x


def _round_up(x, m):
    return ((x + m - 1) // m) * m


def _cdiv(a, b):
    return -(-a // b)


def _pad2d(x, rows, cols):
    r, c = x.shape
    return jnp.pad(x, ((0, rows - r), (0, cols - c)))


# ----------------------------------------------------------------------------
# Kernel: one batch tile of the fused 3-layer MLP.
# ----------------------------------------------------------------------------
def _actor_policy_kernel(obs_ref, w_rep_ref, b_rep_ref,
                         w_h_ref, b_h_ref,
                         w_out_ref, b_out_ref,
                         state_ref, logits_ref):
    # obs may arrive as f32 (fast path, cast on-chip) or bf16 (padded path).
    obs = obs_ref[...].astype(jnp.bfloat16)

    # representation: state = relu(obs @ W_rep + b_rep)   (bf16 in, f32 accum)
    state_f32 = jnp.dot(obs, w_rep_ref[...], preferred_element_type=jnp.float32)
    state_f32 = jnp.maximum(state_f32 + b_rep_ref[...], 0.0)

    # Single bf16 cast: reused for the HBM writeback AND as LHS of W_h matmul.
    state_bf16 = state_f32.astype(jnp.bfloat16)
    state_ref[...] = state_bf16                    # lane-dense (x128) bf16 store

    # actor hidden layer: h = relu(state @ W_h + b_h)
    h = jnp.dot(state_bf16, w_h_ref[...], preferred_element_type=jnp.float32)
    h = jnp.maximum(h + b_h_ref[...], 0.0)

    # actor output layer: logits = h @ W_out + b_out   (no activation)
    logits = jnp.dot(h.astype(jnp.bfloat16), w_out_ref[...],
                     preferred_element_type=jnp.float32)
    logits_ref[...] = (logits + b_out_ref[...]).astype(logits_ref.dtype)


# ----------------------------------------------------------------------------
# Parameter preparation (done once, offline): pad to (8,128)-aligned tiles and
# cast the matmul operands to bf16.
# ----------------------------------------------------------------------------
def prepare_params(raw):
    obs_dim, state_dim = raw["w_rep"].shape
    hid_dim = raw["w_h"].shape[1]
    act_dim = raw["w_out"].shape[1]
    OBS_P = _round_up(obs_dim, _LANE)
    STA_P = _round_up(state_dim, _LANE)
    HID_P = _round_up(hid_dim, _LANE)
    ACT_P = _round_up(act_dim, _LANE)
    return {
        "w_rep": _pad2d(raw["w_rep"], OBS_P, STA_P).astype(jnp.bfloat16),
        "b_rep": _pad2d(raw["b_rep"], 1, STA_P).astype(jnp.float32),
        "w_h":   _pad2d(raw["w_h"], STA_P, HID_P).astype(jnp.bfloat16),
        "b_h":   _pad2d(raw["b_h"], 1, HID_P).astype(jnp.float32),
        "w_out": _pad2d(raw["w_out"], HID_P, ACT_P).astype(jnp.bfloat16),
        "b_out": _pad2d(raw["b_out"], 1, ACT_P).astype(jnp.float32),
        "obs_dim": obs_dim, "state_dim": state_dim, "act_dim": act_dim,
    }


# ----------------------------------------------------------------------------
# Batch-tile selection: minimal padding (<=15 dead rows), >=2 grid steps for
# v7x's two TensorCores when the batch is big enough, VMEM-footprint clamp.
# ----------------------------------------------------------------------------
def _vmem_footprint(bt, OBS_P, STA_P, HID_P, ACT_P, obs_bytes):
    io_blocks = 2 * bt * (OBS_P * obs_bytes + STA_P * 2 + ACT_P * 4)  # dbl-buffered
    weights = 2 * 2 * (OBS_P * STA_P + STA_P * HID_P + HID_P * ACT_P)  # bf16
    biases = 2 * 4 * (STA_P + HID_P + ACT_P)
    interm = bt * (STA_P + HID_P) * 4                                  # live f32 temps
    return io_blocks + weights + biases + interm


def _choose_batch_tile(B, batch_tile, OBS_P, STA_P, HID_P, ACT_P, obs_bytes):
    batch_tile = max(16, _round_up(int(batch_tile), 16))   # defensive rounding
    n_steps = max(1, _cdiv(B, batch_tile))
    if n_steps == 1 and B > 16:
        n_steps = 2                                        # feed both TCs on v7x
    bt = _round_up(_cdiv(B, n_steps), 16)
    # Shrink if the per-step footprint would blow the VMEM budget.
    while bt > 16 and _vmem_footprint(bt, OBS_P, STA_P, HID_P, ACT_P,
                                      obs_bytes) > _VMEM_BUDGET:
        bt = max(16, _round_up(bt // 2, 16))
    return bt


# ----------------------------------------------------------------------------
# Wrapper: ActorPolicy.forward -> (outputs={'state': state}, logits)
# ----------------------------------------------------------------------------
def actor_policy_forward(obs, params, batch_tile=_DEF_BATCH_TILE):
    B, obs_dim_in = obs.shape
    obs_dim, state_dim, act_dim = params["obs_dim"], params["state_dim"], params["act_dim"]
    assert obs_dim_in == obs_dim
    OBS_P, STA_P = params["w_rep"].shape
    HID_P = params["w_h"].shape[1]
    ACT_P = params["w_out"].shape[1]

    obs_bytes = 4 if (OBS_P == obs_dim) else 2   # f32 fast path vs padded bf16 path
    bt = _choose_batch_tile(B, batch_tile, OBS_P, STA_P, HID_P, ACT_P, obs_bytes)
    B_pad = _round_up(B, bt)

    if OBS_P == obs_dim and B_pad == B:
        # Fast path: no padding needed -> feed f32 obs directly, cast on-chip.
        obs_in = obs
    else:
        # Pad rows/cols and cast to bf16 in a single fused pass.
        # TODO(synk): ideally the producer of `obs` emits it already padded/bf16.
        obs_in = _pad2d(obs, B_pad, OBS_P).astype(jnp.bfloat16)

    grid = (B_pad // bt,)

    flops = 2 * B_pad * (OBS_P * STA_P + STA_P * HID_P + HID_P * ACT_P)
    bytes_accessed = (
        int(obs_in.size) * obs_in.dtype.itemsize
        + sum(int(params[k].size) * 2 for k in ("w_rep", "w_h", "w_out"))
        + sum(int(params[k].size) * 4 for k in ("b_rep", "b_h", "b_out"))
        + B_pad * STA_P * 2          # bf16 state writeback
        + B_pad * ACT_P * 4          # f32 logits writeback
    )

    def const(shape):  # weight / bias block: identical every grid step -> VMEM-resident
        return pl.BlockSpec(shape, lambda i: (0, 0))

    state_p, logits_p = pl.pallas_call(
        _actor_policy_kernel,
        out_shape=(
            jax.ShapeDtypeStruct((B_pad, STA_P), jnp.bfloat16),
            jax.ShapeDtypeStruct((B_pad, ACT_P), jnp.float32),
        ),
        grid_spec=pltpu.PrefetchScalarGridSpec(
            num_scalar_prefetch=0,
            grid=grid,
            in_specs=[
                pl.BlockSpec((bt, OBS_P), lambda i: (i, 0)),   # obs (batch tiled)
                const((OBS_P, STA_P)), const((1, STA_P)),      # W_rep, b_rep
                const((STA_P, HID_P)), const((1, HID_P)),      # W_h,   b_h
                const((HID_P, ACT_P)), const((1, ACT_P)),      # W_out, b_out
            ],
            out_specs=(
                pl.BlockSpec((bt, STA_P), lambda i: (i, 0)),   # state (bf16)
                pl.BlockSpec((bt, ACT_P), lambda i: (i, 0)),   # logits (f32)
            ),
        ),
        compiler_params=pltpu.CompilerParams(
            dimension_semantics=("parallel",),                 # both TCs on v7x
            vmem_limit_bytes=_VMEM_LIMIT),
        cost_estimate=pl.CostEstimate(
            flops=flops, transcendentals=0, bytes_accessed=bytes_accessed),
    )(obs_in, params["w_rep"], params["b_rep"],
      params["w_h"], params["b_h"], params["w_out"], params["b_out"])

    # Slice padded rows/columns back to the true dims (padded zero-logit
    # columns must never reach the categorical distribution).
    state = state_p[:B, :state_dim]          # bf16
    logits = logits_p[:B, :act_dim]          # f32
    outputs = {"state": state}
    # CategoricalDistribution only stores logits; return them directly.
    return outputs, logits


# ----------------------------------------------------------------------------
# Raw-parameter init + pure-JAX reference (f32, unpadded).
# ----------------------------------------------------------------------------
def init_params(key, obs_dim, state_dim, hidden, act_dim):
    ks = jax.random.split(key, 6)
    scale = 0.1
    return {
        "w_rep": scale * jax.random.normal(ks[0], (obs_dim, state_dim), jnp.float32),
        "b_rep": scale * jax.random.normal(ks[1], (1, state_dim), jnp.float32),
        "w_h":   scale * jax.random.normal(ks[2], (state_dim, hidden), jnp.float32),
        "b_h":   scale * jax.random.normal(ks[3], (1, hidden), jnp.float32),
        "w_out": scale * jax.random.normal(ks[4], (hidden, act_dim), jnp.float32),
        "b_out": scale * jax.random.normal(ks[5], (1, act_dim), jnp.float32),
    }


def reference_forward(obs, p):
    state = jnp.maximum(obs @ p["w_rep"] + p["b_rep"], 0.0)
    h = jnp.maximum(state @ p["w_h"] + p["b_h"], 0.0)
    logits = h @ p["w_out"] + p["b_out"]
    return state, logits


if __name__ == "__main__":
    key = jax.random.PRNGKey(0)
    k_obs, k_par = jax.random.split(key)

    B, OBS, STATE, HID, ACT = 8, 16, 32, 32, 8
    obs = jax.random.normal(k_obs, (B, OBS), jnp.float32)

    raw_params = init_params(k_par, OBS, STATE, HID, ACT)
    params = prepare_params(raw_params)   # pad + bf16 cast, once

    outputs, logits = actor_policy_forward(obs, params)
    jax.block_until_ready((outputs["state"], logits))

    ref_state, ref_logits = reference_forward(obs, raw_params)
    # bf16 matmul inputs + bf16 state writeback (f32 accumulation) -> looser
    # tolerance than pure f32.
    assert outputs["state"].shape == (B, STATE) and logits.shape == (B, ACT)
    assert jnp.allclose(outputs["state"].astype(jnp.float32), ref_state,
                        atol=2e-2, rtol=2e-2)
    assert jnp.allclose(logits, ref_logits, atol=2e-2, rtol=2e-2)

    print("KERNEL_OK")
</pallas_src>

<mosaic_0001>
module attributes {stable_mosaic.version = 11 : i64} {
  func.func @_actor_policy_kernel(%arg0: i32, %arg1: memref<16x128xbf16, #tpu.memory_space<vmem>>, %arg2: memref<128x128xbf16, #tpu.memory_space<vmem>>, %arg3: memref<1x128xf32, #tpu.memory_space<vmem>>, %arg4: memref<128x128xbf16, #tpu.memory_space<vmem>>, %arg5: memref<1x128xf32, #tpu.memory_space<vmem>>, %arg6: memref<128x128xbf16, #tpu.memory_space<vmem>>, %arg7: memref<1x128xf32, #tpu.memory_space<vmem>>, %arg8: memref<16x128xbf16, #tpu.memory_space<vmem>>, %arg9: memref<16x128xf32, #tpu.memory_space<vmem>>) attributes {dimension_semantics = [#tpu.dimension_semantics<parallel>], iteration_bounds = array<i64: 1>, scalar_prefetch = 0 : i64, scratch_operands = 0 : i64, tpu.core_type = #tpu.core_type<tc>, window_params = [{transform_indices = @transform_0, window_bounds = array<i64: 16, 128>}, {pipeline_mode = #tpu.pipeline_mode<synchronous>, transform_indices = @transform_1, window_bounds = array<i64: 128, 128>}, {pipeline_mode = #tpu.pipeline_mode<synchronous>, transform_indices = @transform_2, window_bounds = array<i64: 1, 128>}, {pipeline_mode = #tpu.pipeline_mode<synchronous>, transform_indices = @transform_3, window_bounds = array<i64: 128, 128>}, {pipeline_mode = #tpu.pipeline_mode<synchronous>, transform_indices = @transform_4, window_bounds = array<i64: 1, 128>}, {pipeline_mode = #tpu.pipeline_mode<synchronous>, transform_indices = @transform_5, window_bounds = array<i64: 128, 128>}, {pipeline_mode = #tpu.pipeline_mode<synchronous>, transform_indices = @transform_6, window_bounds = array<i64: 1, 128>}, {transform_indices = @transform_7, window_bounds = array<i64: 16, 128>}, {transform_indices = @transform_8, window_bounds = array<i64: 16, 128>}]} {
    %c0 = arith.constant 0 : index
    %c0_0 = arith.constant 0 : index
    %0 = vector.load %arg1[%c0, %c0_0] : memref<16x128xbf16, #tpu.memory_space<vmem>>, vector<16x128xbf16>
    %c0_1 = arith.constant 0 : index
    %c0_2 = arith.constant 0 : index
    %1 = vector.load %arg2[%c0_1, %c0_2] : memref<128x128xbf16, #tpu.memory_space<vmem>>, vector<128x128xbf16>
    %cst = arith.constant dense<0.000000e+00> : vector<16x128xf32>
    %2 = tpu.matmul %0, %1, %cst {dimension_numbers = #tpu.dot_dimension_numbers<[1], [0], [0], [1], [0, 0, 1, 1], [], []>} : vector<16x128xbf16>, vector<128x128xbf16>, vector<16x128xf32> -> vector<16x128xf32>
    %c0_3 = arith.constant 0 : index
    %c0_4 = arith.constant 0 : index
    %3 = vector.load %arg3[%c0_3, %c0_4] : memref<1x128xf32, #tpu.memory_space<vmem>>, vector<1x128xf32>
    %4 = vector.broadcast %3 : vector<1x128xf32> to vector<16x128xf32>
    %5 = arith.addf %2, %4 : vector<16x128xf32>
    %cst_5 = arith.constant 0.000000e+00 : f32
    %6 = vector.broadcast %cst_5 : f32 to vector<16x128xf32>
    %7 = arith.maximumf %5, %6 : vector<16x128xf32>
    %8 = arith.truncf %7 : vector<16x128xf32> to vector<16x128xbf16>
    %c0_6 = arith.constant 0 : index
    %c0_7 = arith.constant 0 : index
    %9 = vector.load %arg8[%c0_6, %c0_7] : memref<16x128xbf16, #tpu.memory_space<vmem>>, vector<16x128xbf16>
    tpu.vector_store %arg8[%c0_6, %c0_7], %8 {strides = array<i32>} : memref<16x128xbf16, #tpu.memory_space<vmem>>, vector<16x128xbf16>,
    %c0_8 = arith.constant 0 : index
    %c0_9 = arith.constant 0 : index
    %10 = vector.load %arg4[%c0_8, %c0_9] : memref<128x128xbf16, #tpu.memory_space<vmem>>, vector<128x128xbf16>
    %cst_10 = arith.constant dense<0.000000e+00> : vector<16x128xf32>
    %11 = tpu.matmul %8, %10, %cst_10 {dimension_numbers = #tpu.dot_dimension_numbers<[1], [0], [0], [1], [0, 0, 1, 1], [], []>} : vector<16x128xbf16>, vector<128x128xbf16>, vector<16x128xf32> -> vector<16x128xf32>
    %c0_11 = arith.constant 0 : index
    %c0_12 = arith.constant 0 : index
    %12 = vector.load %arg5[%c0_11, %c0_12] : memref<1x128xf32, #tpu.memory_space<vmem>>, vector<1x128xf32>
    %13 = vector.broadcast %12 : vector<1x128xf32> to vector<16x128xf32>
    %14 = arith.addf %11, %13 : vector<16x128xf32>
    %cst_13 = arith.constant 0.000000e+00 : f32
    %15 = vector.broadcast %cst_13 : f32 to vector<16x128xf32>
    %16 = arith.maximumf %14, %15 : vector<16x128xf32>
    %17 = arith.truncf %16 : vector<16x128xf32> to vector<16x128xbf16>
    %c0_14 = arith.constant 0 : index
    %c0_15 = arith.constant 0 : index
    %18 = vector.load %arg6[%c0_14, %c0_15] : memref<128x128xbf16, #tpu.memory_space<vmem>>, vector<128x128xbf16>
    %cst_16 = arith.constant dense<0.000000e+00> : vector<16x128xf32>
    %19 = tpu.matmul %17, %18, %cst_16 {dimension_numbers = #tpu.dot_dimension_numbers<[1], [0], [0], [1], [0, 0, 1, 1], [], []>} : vector<16x128xbf16>, vector<128x128xbf16>, vector<16x128xf32> -> vector<16x128xf32>
    %c0_17 = arith.constant 0 : index
    %c0_18 = arith.constant 0 : index
    %20 = vector.load %arg7[%c0_17, %c0_18] : memref<1x128xf32, #tpu.memory_space<vmem>>, vector<1x128xf32>
    %21 = vector.broadcast %20 : vector<1x128xf32> to vector<16x128xf32>
    %22 = arith.addf %19, %21 : vector<16x128xf32>
    %c0_19 = arith.constant 0 : index
    %c0_20 = arith.constant 0 : index
    %23 = vector.load %arg9[%c0_19, %c0_20] : memref<16x128xf32, #tpu.memory_space<vmem>>, vector<16x128xf32>
    tpu.vector_store %arg9[%c0_19, %c0_20], %22 {strides = array<i32>} : memref<16x128xf32, #tpu.memory_space<vmem>>, vector<16x128xf32>,
    return
  }
  func.func @transform_0(%arg0: i32) -> (i32, i32) {
    %c0_i32 = arith.constant 0 : i32
    %c0_i32_0 = arith.constant 0 : i32
    return %arg0, %c0_i32 : i32, i32
  }
  func.func @transform_1(%arg0: i32) -> (i32, i32) {
    %c0_i32 = arith.constant 0 : i32
    %c0_i32_0 = arith.constant 0 : i32
    %c0_i32_1 = arith.constant 0 : i32
    return %c0_i32, %c0_i32_0 : i32, i32
  }
  func.func @transform_2(%arg0: i32) -> (i32, i32) {
    %c0_i32 = arith.constant 0 : i32
    %c0_i32_0 = arith.constant 0 : i32
    %c0_i32_1 = arith.constant 0 : i32
    return %c0_i32, %c0_i32_0 : i32, i32
  }
  func.func @transform_3(%arg0: i32) -> (i32, i32) {
    %c0_i32 = arith.constant 0 : i32
    %c0_i32_0 = arith.constant 0 : i32
    %c0_i32_1 = arith.constant 0 : i32
    return %c0_i32, %c0_i32_0 : i32, i32
  }
  func.func @transform_4(%arg0: i32) -> (i32, i32) {
    %c0_i32 = arith.constant 0 : i32
    %c0_i32_0 = arith.constant 0 : i32
    %c0_i32_1 = arith.constant 0 : i32
    return %c0_i32, %c0_i32_0 : i32, i32
  }
  func.func @transform_5(%arg0: i32) -> (i32, i32) {
    %c0_i32 = arith.constant 0 : i32
    %c0_i32_0 = arith.constant 0 : i32
    %c0_i32_1 = arith.constant 0 : i32
    return %c0_i32, %c0_i32_0 : i32, i32
  }
  func.func @transform_6(%arg0: i32) -> (i32, i32) {
    %c0_i32 = arith.constant 0 : i32
    %c0_i32_0 = arith.constant 0 : i32
    %c0_i32_1 = arith.constant 0 : i32
    return %c0_i32, %c0_i32_0 : i32, i32
  }
  func.func @transform_7(%arg0: i32) -> (i32, i32) {
    %c0_i32 = arith.constant 0 : i32
    %c0_i32_0 = arith.constant 0 : i32
    return %arg0, %c0_i32 : i32, i32
  }
  func.func @transform_8(%arg0: i32) -> (i32, i32) {
    %c0_i32 = arith.constant 0 : i32
    %c0_i32_0 = arith.constant 0 : i32
    return %arg0, %c0_i32 : i32, i32
  }
}

</mosaic_0001>

<bundles_post_ra>
// kernel: tpu_custom_call.1
= control target key start
LH: loop header
LB: loop body
LE: loop exit
PB: predicated region body
PF: predicated region fallthrough
CT: control target
= control target key end

     0   :  { %14 = vsyncpa [#allocation3], 0  ;;  %s797_s0 = inlined_call_operand.hbm [shape: bf16[16,128], index: 0, kind: input, shape index: {}]   ;;  %s798_s1 = inlined_call_operand.hbm [shape: bf16[128,128], index: 1, kind: input, shape index: {}]   ;;  %s799_s2 = inlined_call_operand.vmem [shape: f32[1,128], index: 2, kind: input, shape index: {}]   ;;  %s800_s3 = inlined_call_operand.hbm [shape: bf16[128,128], index: 3, kind: input, shape index: {}]   ;;  %s801_s4 = inlined_call_operand.vmem [shape: f32[1,128], index: 4, kind: input, shape index: {}]   ;;  %s802_s5 = inlined_call_operand.hbm [shape: bf16[128,128], index: 5, kind: input, shape index: {}]   ;;  %s803_s6 = inlined_call_operand.vmem [shape: f32[1,128], index: 6, kind: input, shape index: {}]   ;;  %s804_s7 = inlined_call_operand.hbm [shape: bf16[16,128], index: 7, kind: output, shape index: {0}]   ;;  %s805_s8 = inlined_call_operand.hbm [shape: f32[16,128], index: 8, kind: output, shape index: {1}]  }
   0x1   :  { %15 = vsyncpa [#allocation6], 0 }
   0x2   :  { %16 = vsyncpa [#allocation9], 0 }
   0x3   :  { %17 = vsyncpa [#allocation4], 0 }
   0x4   :  { %18 = vsyncpa [#allocation12], 0  ;;  %s36_s29 = sshll.u32 %s798_s1, 4  ;;  %s700_s30 = smov [#allocation5]   ;;  %s37_s29 = int_to_ptr.hbm [resolvable:$true] %s36_s29 }
   0x5   :  { %s38_s9 = sshll.u32 %s700_s30, 4  ;;  %s23_s12 = sshll.u32 %s797_s0, 4  ;;  %s39_s9 = int_to_ptr.vmem [resolvable:$true] %s38_s9  ;;  %s24_s12 = int_to_ptr.hbm [resolvable:$true] %s23_s12 }
   0x6   :  { %s701_s13 = smov 64   ;;  %s702_s14 = smov 4  }
   0x7   :  { %44 = dma.hbm_to_vmem [thread:$0]  %s37_s29, 1024, %s39_s9, [#allocation6], %s701_s13, %s701_s13, %s702_s14  }
   0x8   :  { %s703_s15 = smov [#allocation2]   ;;  %s51_s1 = sshll.u32 %s800_s3, 4  ;;  %s52_s1 = int_to_ptr.hbm [resolvable:$true] %s51_s1 }
   0x9   :  { %s25_s16 = sshll.u32 %s703_s15, 4  ;;  %s66_s20 = sshll.u32 %s802_s5, 4  ;;  %s26_s16 = int_to_ptr.vmem [resolvable:$true] %s25_s16  ;;  %s67_s20 = int_to_ptr.hbm [resolvable:$true] %s66_s20 }
   0xa   :  { %31 = dma.hbm_to_vmem [thread:$0]  %s24_s12, 128, %s26_s16, [#allocation3], %s701_s13, %s701_s13, %s702_s14  }
   0xb   :  { %s704_s21 = smov [#allocation7]   ;;  %s705_s23 = smov [#allocation8]  }
   0xc   :  { %s53_s22 = sshll.u32 %s704_s21, 4  ;;  %s68_s3 = sshll.u32 %s705_s23, 4  ;;  %s54_s22 = int_to_ptr.vmem [resolvable:$true] %s53_s22  ;;  %s69_s3 = int_to_ptr.vmem [resolvable:$true] %s68_s3 }
   0xd   :  { %59 = dma.hbm_to_vmem [thread:$0]  %s52_s1, 1024, %s54_s22, [#allocation6], %s701_s13, %s701_s13, %s702_s14  }
   0xe   :  { %74 = dma.hbm_to_vmem [thread:$0]  %s67_s20, 1024, %s69_s3, [#allocation9], %s701_s13, %s701_s13, %s702_s14  }
   0xf   :  { %690 = dma.done.wait [#allocation3], 128  }
  0x10   :  { %691 = vsyncadd [#allocation3], 4294967168 }
  0x11   :  { %692 = dma.done.wait [#allocation6], 2048  }
  0x12   :  { %693 = vsyncadd [#allocation6], 4294965248 }
  0x13   :  { %694 = dma.done.wait [#allocation9], 1024  }
  0x14   :  { %695 = vsyncadd [#allocation9], 4294966272  ;;  %v511_v0 = vld [vmem:[#allocation5 + $0x38] sm:$0xff]  ;;  %v510_v1 = vld [vmem:[#allocation5 + $0x30] sm:$0xff]  ;;  %s706_s26 = smov [#allocation10]   ;;  %s370_s30 = sshll.u32 %s804_s7, 4  ;;  %s371_s30 = int_to_ptr.hbm [resolvable:$true] %s370_s30 }
  0x15   :  { %169 = vmatpush.bf16.msra.mxu0 %v511_v0  ;;  %v519_v2 = vld [vmem:[#allocation7 + $0x38] sm:$0xff]  ;;  %v518_v3 = vld [vmem:[#allocation7 + $0x30] sm:$0xff]  ;;  %v509_v4 = vld [vmem:[#allocation5 + $0x28] sm:$0xff]  ;;  %s368_s27 = sshll.u32 %s706_s26, 4  ;;  %s707_s10 = smov [#allocation11]   ;;  %s369_s27 = int_to_ptr.vmem [resolvable:$true] %s368_s27 }
  0x16   :  { %263 = vmatpush.bf16.msra.mxu1 %v519_v2  ;;  %v517_v5 = vld [vmem:[#allocation7 + $0x28] sm:$0xff]  ;;  %v508_v6 = vld [vmem:[#allocation5 + $0x20] sm:$0xff]  ;;  %v507_v7 = vld [vmem:[#allocation5 + $0x18] sm:$0xff]  ;;  %s381_s11 = sshll.u32 %s707_s10, 4  ;;  %s383_s16 = sshll.u32 %s805_s8, 4  ;;  %s382_s11 = int_to_ptr.vmem [resolvable:$true] %s381_s11  ;;  %s384_s16 = int_to_ptr.hbm [resolvable:$true] %s383_s16 }
  0x17   :  { %v506_v8 = vld [vmem:[#allocation5 + $0x10] sm:$0xff]  ;;  %v505_v9 = vld [vmem:[#allocation5 + $0x8] sm:$0xff]  ;;  %v504_v10 = vld [vmem:[#allocation5] sm:$0xff]  ;;  %s708_s7 = smov 128  }
  0x18   :  { %v503_v11 = vld [vmem:[#allocation2] sm:$0xff]  ;;  %v516_v12 = vld [vmem:[#allocation7 + $0x20] sm:$0xff]  ;;  %v514_v14 = vld [vmem:[#allocation7 + $0x10] sm:$0xff] }
  0x19   :  { %170 = vmatpush.bf16.msra.mxu0 %v510_v1  ;;  %v515_v13 = vld [vmem:[#allocation7 + $0x18] sm:$0xff]  ;;  %v513_v15 = vld [vmem:[#allocation7 + $0x8] sm:$0xff]  ;;  %v512_v16 = vld [vmem:[#allocation7] sm:$0xff] }
  0x1a   :  { %264 = vmatpush.bf16.msra.mxu1 %v518_v3  ;;  %v527_v17 = vld [vmem:[#allocation8 + $0x38] sm:$0xff]  ;;  %v526_v18 = vld [vmem:[#allocation8 + $0x30] sm:$0xff]  ;;  %v525_v19 = vld [vmem:[#allocation8 + $0x28] sm:$0xff] }
  0x1b   :  { %348 = vmatpush.bf16.msra.mxu2 %v527_v17  ;;  %v524_v20 = vld [vmem:[#allocation8 + $0x20] sm:$0xff]  ;;  %v543_v21 = vld [vmem:[%s799_s2] ss:$0 sm:$0xff]  ;;  %v522_v35 = vld [vmem:[#allocation8 + $0x10] sm:$0xff] }
  0x1c   :  { %v523_v34 = vld [vmem:[#allocation8 + $0x18] sm:$0xff]  ;;  %v521_v36 = vld [vmem:[#allocation8 + $0x8] sm:$0xff]  ;;  %v520_v37 = vld [vmem:[#allocation8] sm:$0xff] }
  0x1d   :  { %171 = vmatpush.bf16.msra.mxu0 %v509_v4  ;;  %v544_v39 = vld [vmem:[%s801_s4] ss:$0 sm:$0xff] }
  0x1e   :  { %265 = vmatpush.bf16.msra.mxu1 %v517_v5  ;;  %v545_v46 = vld [vmem:[%s803_s6] ss:$0 sm:$0xff] }
  0x1f   :  { %349 = vmatpush.bf16.msra.mxu2 %v526_v18 }
  0x21   :  { %172 = vmatpush.bf16.msra.mxu0 %v508_v6 }
  0x22   :  { %266 = vmatpush.bf16.msra.mxu1 %v516_v12 }
  0x23   :  { %350 = vmatpush.bf16.msra.mxu2 %v525_v19 }
  0x25   :  { %173 = vmatpush.bf16.msra.mxu0 %v507_v7 }
  0x26   :  { %267 = vmatpush.bf16.msra.mxu1 %v515_v13 }
  0x27   :  { %351 = vmatpush.bf16.msra.mxu2 %v524_v20 }
  0x29   :  { %174 = vmatpush.bf16.msra.mxu0 %v506_v8 }
  0x2a   :  { %268 = vmatpush.bf16.msra.mxu1 %v514_v14 }
  0x2b   :  { %352 = vmatpush.bf16.msra.mxu2 %v523_v34 }
  0x2d   :  { %175 = vmatpush.bf16.msra.mxu0 %v505_v9 }
  0x2e   :  { %269 = vmatpush.bf16.msra.mxu1 %v513_v15 }
  0x2f   :  { %353 = vmatpush.bf16.msra.mxu2 %v522_v35 }
  0x31   :  { %176 = vmatpush.bf16.msra.mxu0 %v504_v10 }
  0x32   :  { %270 = vmatpush.bf16.msra.mxu1 %v512_v16 }
  0x33   :  { %354 = vmatpush.bf16.msra.mxu2 %v521_v36 }
  0x34   :  { %177 = vmatmul.bf16.vlgmr.msra.gmra.mxu0 %v503_v11 }
  0x37   :  { %355 = vmatpush.bf16.msra.mxu2 %v520_v37 }
  0xb1   :  { %v178_v22 = vpop.f32.mrf.mxu0 }
  0xb2   :  { %v179_v23 = vadd.f32 %v543_v21, %v178_v22 }
  0xb4   :  { %v183_v24 = vmax.f32 %v179_v23, 0.0 }
  0xb6   :  { %v185_v27 = vpack.c.bf16 %v183_v24, %v183_v24 }
  0xb8   :  { %v211_v31 = vunpack.c.l.b16 %v185_v27 }
  0xb9   :  { %v180_v25 = vpop.f32.mrf.mxu0 }
  0xba   :  { %v181_v26 = vadd.f32 %v543_v21, %v180_v25 }
  0xbc   :  { %v184_v28 = vmax.f32 %v181_v26, 0.0 }
  0xbe   :  { %v186_v29 = vpack.c.bf16 %v184_v28, %v184_v28  ;;  %v531_v30 = vpack.c.bf16 %v184_v28, %v183_v24 }
  0xc0   :  { %532 = vst [vmem:[#allocation10] sm:$0xff] %v531_v30   ;;  %v212_v32 = vunpack.c.l.b16 %v186_v29 }
  0xc1   :  { %376 = dma.vmem_to_hbm [thread:$0]  %s369_s27, 128, %s371_s30, [#allocation4], %s701_s13, %s701_s13, %s702_s14  }
  0xc2   :  { %v213_v33 = vpack.c.b16 %v212_v32, %v211_v31  ;;  %s709_s13 = smov 8  }
  0xc4   :  { %271 = vmatmul.bf16.vlgmr.msra.gmra.mxu1 %v213_v33 }
 0x141   :  { %v272_v38 = vpop.f32.mrf.mxu1 }
 0x142   :  { %v273_v40 = vadd.f32 %v544_v39, %v272_v38 }
 0x144   :  { %v277_v43 = vmax.f32 %v273_v40, 0.0 }
 0x149   :  { %v274_v41 = vpop.f32.mrf.mxu1 }
 0x14a   :  { %v275_v42 = vadd.f32 %v544_v39, %v274_v41 }
 0x14c   :  { %v278_v44 = vmax.f32 %v275_v42, 0.0 }
 0x14e   :  { %v279_v45 = vpack.c.bf16 %v278_v44, %v277_v43 }
 0x150   :  { %356 = vmatmul.bf16.vlgmr.msra.gmra.mxu2 %v279_v45 }
 0x1d3   :  { %v357_v47 = vpop.f32.mrf.mxu2 }
 0x1d4   :  { %v358_v48 = vadd.f32 %v545_v46, %v357_v47 }
 0x1d6   :  { %362 = vst [vmem:[#allocation11] sm:$0xff] %v358_v48 }
 0x1db   :  { %v359_v49 = vpop.f32.mrf.mxu2 }
 0x1dc   :  { %v360_v50 = vadd.f32 %v545_v46, %v359_v49 }
 0x1de   :  { %363 = vst [vmem:[#allocation11 + $0x8] sm:$0xff] %v360_v50 }
 0x1df   :  { %389 = dma.vmem_to_hbm [thread:$0]  %s382_s11, 256, %s384_s16, [#allocation12], %s708_s7, %s708_s7, %s709_s13  }
 0x1e0   :  { %696 = dma.done.wait [#allocation4], 128  }
 0x1e1   :  { %697 = vsyncadd [#allocation4], 4294967168 }
 0x1e2   :  { %698 = dma.done.wait [#allocation12], 256  }
 0x1e3   :  { %699 = vsyncadd [#allocation12], 4294967040 }
 0x1e4   :  { %398 = vsyncpa [#allocation3], 1 }
 0x1e5   :  { %399 = vsyncpa [#allocation6], 1 }
 0x1e6   :  { %400 = vsyncpa [#allocation9], 1 }
 0x1e7   :  { %401 = vsyncpa [#allocation4], 1 }
 0x1e8   :  { %402 = vsyncpa [#allocation12], 1 }

</bundles_post_ra>
